<compile_context>
chip_gen: v5e
topology: v5e:2x2
jax: 0.10.0
libtpu: 0.0.40
codegen_flags: <defaults>
</compile_context>

<pallas_src>
import math
import functools

import jax
import jax.numpy as jnp
from jax.experimental import pallas as pl
from jax.experimental.pallas import tpu as pltpu

DIM = 128             # hidden dim (multiple of 128 -> lane aligned)
BATCH = 16            # number of rows in the example
LN_EPS = 1e-5
_INV_SQRT2 = 1.0 / math.sqrt(2.0)
# HBM-bound: ~1 MiB of (users+items) f32 input per grid step amortizes the
# per-step overhead (~85%+ of HBM roofline per measured tiled-memcpy data).
# Good default for v5e/v6e; on v7x pass row_tile=2048 for peak bandwidth.
_DEFAULT_MAX_ROW_TILE = 1024


def _predictor_kernel(u_ref, it_ref, w1_ref, vec_ref, w2_ref, o_ref):
    u = u_ref[...]                                   # (TB, D) f32
    it = it_ref[...]                                 # (TB, D) f32

    b1 = vec_ref[0:1, :]                             # (1, D) f32
    gamma = vec_ref[1:2, :]
    beta = vec_ref[2:3, :]
    b2 = vec_ref[3:4, :]

    # ---- Linear 1: bf16 operands on the MXU, f32 accumulation ----
    h = jnp.dot(u.astype(jnp.bfloat16), w1_ref[...],
                preferred_element_type=jnp.float32) + b1

    # ---- LayerNorm over last dim, one-pass stats (f32) ----
    inv_d = 1.0 / h.shape[-1]
    mean = jnp.sum(h, axis=-1, keepdims=True) * inv_d
    meansq = jnp.sum(h * h, axis=-1, keepdims=True) * inv_d
    var = meansq - mean * mean
    hn = (h - mean) * jax.lax.rsqrt(var + LN_EPS)
    hn = hn * gamma + beta

    # ---- GELU (exact erf, matching PyTorch default approximate='none') ----
    act = 0.5 * hn * (1.0 + jax.lax.erf(hn * _INV_SQRT2))

    # ---- Linear 2: bf16 operands on the MXU, f32 accumulation ----
    y = jnp.dot(act.astype(jnp.bfloat16), w2_ref[...],
                preferred_element_type=jnp.float32) + b2

    # ---- sum(y * items, -1) as ones(1,D) contraction -> lane-dense (1, TB) ----
    z = y * it                                        # (TB, D) f32
    ones = jnp.ones((1, z.shape[-1]), jnp.float32)
    o_ref[...] = jax.lax.dot_general(
        ones, z,
        dimension_numbers=(((1,), (1,)), ((), ())),   # contract D with D
        preferred_element_type=jnp.float32)           # (1, TB)


def prepare_params(params):
    """Hoisted, one-time parameter prep: bf16 weights + packed (4, D) vector params."""
    w1, b1, gamma, beta, w2, b2 = params
    vec = jnp.concatenate(
        [jnp.reshape(b1, (1, -1)), jnp.reshape(gamma, (1, -1)),
         jnp.reshape(beta, (1, -1)), jnp.reshape(b2, (1, -1))], axis=0
    ).astype(jnp.float32)                              # (4, D)
    return (w1.astype(jnp.bfloat16), vec, w2.astype(jnp.bfloat16))


def _pick_row_tile(B, cap):
    if B <= cap:
        return B        # single fat step; block == full batch dim (always legal)
    return cap          # multiple of 8; ragged tail masked by Pallas


@functools.partial(jax.jit, static_argnames=("row_tile",))
def predictor_forward(users, items, kernel_params, row_tile=None):
    """users, items: (B, dim) float32.  kernel_params from prepare_params().
    Returns (B,) float32."""
    B, D = users.shape
    assert items.shape == (B, D)
    w1_bf16, vec, w2_bf16 = kernel_params

    if row_tile is None:
        row_tile = _pick_row_tile(B, _DEFAULT_MAX_ROW_TILE)
    num_tiles = pl.cdiv(B, row_tile)

    row_spec = pl.BlockSpec((row_tile, D), lambda i: (i, 0))

    # Parameters have a constant block index across the grid: when there is
    # more than one step, single-buffer them (no re-DMA, no 2nd VMEM copy).
    if num_tiles > 1:
        def param_spec(shape):
            return pl.BlockSpec(shape, lambda i: (0, 0),
                                pipeline_mode=pl.Buffered(1))
    else:
        def param_spec(shape):
            return pl.BlockSpec(shape, lambda i: (0, 0))

    out = pl.pallas_call(
        _predictor_kernel,
        out_shape=jax.ShapeDtypeStruct((1, B), jnp.float32),   # lane-dense
        grid_spec=pltpu.PrefetchScalarGridSpec(
            num_scalar_prefetch=0,
            grid=(num_tiles,),
            in_specs=[
                row_spec,              # users rows
                row_spec,              # items rows
                param_spec((D, D)),    # W1 (in, out), bf16
                param_spec((4, D)),    # packed [b1; gamma; beta; b2], f32
                param_spec((D, D)),    # W2 (in, out), bf16
            ],
            out_specs=pl.BlockSpec((1, row_tile), lambda i: (0, i)),
        ),
        compiler_params=pltpu.CompilerParams(
            dimension_semantics=("parallel",)),   # megacore-shardable on v7x
    )(users, items, w1_bf16, vec, w2_bf16)
    return out[0, :]


def init_params(key, dim):
    """Deterministic synthetic parameter init (PyTorch-Linear-like uniform bound)."""
    k1, k2, k3, k4 = jax.random.split(key, 4)
    bound = 1.0 / math.sqrt(dim)
    w1 = jax.random.uniform(k1, (dim, dim), jnp.float32, -bound, bound)
    b1 = jax.random.uniform(k2, (1, dim), jnp.float32, -bound, bound)
    gamma = jnp.ones((1, dim), jnp.float32)     # LayerNorm weight
    beta = jnp.zeros((1, dim), jnp.float32)     # LayerNorm bias
    w2 = jax.random.uniform(k3, (dim, dim), jnp.float32, -bound, bound)
    b2 = jax.random.uniform(k4, (1, dim), jnp.float32, -bound, bound)
    return (w1, b1, gamma, beta, w2, b2)


def predictor_reference(users, items, params):
    """Pure-f32 JAX reference of the PyTorch forward."""
    w1, b1, gamma, beta, w2, b2 = params
    h = users @ w1 + b1
    mean = jnp.mean(h, axis=-1, keepdims=True)
    var = jnp.mean((h - mean) ** 2, axis=-1, keepdims=True)
    hn = (h - mean) / jnp.sqrt(var + LN_EPS) * gamma + beta
    act = 0.5 * hn * (1.0 + jax.lax.erf(hn * _INV_SQRT2))
    y = act @ w2 + b2
    return jnp.sum(y * items, axis=-1)


def predictor_reference_mixed(users, items, params):
    """Reference with the kernel's mixed precision (bf16 MXU operands, f32 else)."""
    w1, b1, gamma, beta, w2, b2 = params
    h = jnp.dot(users.astype(jnp.bfloat16), w1.astype(jnp.bfloat16),
                preferred_element_type=jnp.float32) + b1
    mean = jnp.mean(h, axis=-1, keepdims=True)
    var = jnp.mean(h * h, axis=-1, keepdims=True) - mean * mean
    hn = (h - mean) * jax.lax.rsqrt(var + LN_EPS) * gamma + beta
    act = 0.5 * hn * (1.0 + jax.lax.erf(hn * _INV_SQRT2))
    y = jnp.dot(act.astype(jnp.bfloat16), w2.astype(jnp.bfloat16),
                preferred_element_type=jnp.float32) + b2
    return jnp.sum(y * items, axis=-1)


if __name__ == "__main__":
    key = jax.random.PRNGKey(0)
    kp, ku, ki = jax.random.split(key, 3)

    params = init_params(kp, DIM)
    kernel_params = prepare_params(params)       # bf16 casts / packing hoisted
    users = jax.random.normal(ku, (BATCH, DIM), jnp.float32)
    items = jax.random.normal(ki, (BATCH, DIM), jnp.float32)

    out = jax.block_until_ready(predictor_forward(users, items, kernel_params))
    assert out.shape == (BATCH,)

    # Tight check against a reference that uses the kernel's mixed precision.
    ref_mixed = predictor_reference_mixed(users, items, params)
    assert jnp.allclose(out, ref_mixed, atol=2e-3, rtol=2e-3), (out, ref_mixed)

    # Loose check against the pure-f32 module semantics (bf16 MXU operands
    # introduce ~0.5-1% relative error at this output magnitude).
    ref = predictor_reference(users, items, params)
    assert jnp.allclose(out, ref, atol=1.5e-1, rtol=5e-2), (out, ref)

    print("KERNEL_OK")
</pallas_src>

<mosaic_0001>
module attributes {stable_mosaic.version = 11 : i64} {
  func.func @_predictor_kernel(%arg0: i32, %arg1: memref<16x128xf32, #tpu.memory_space<vmem>>, %arg2: memref<16x128xf32, #tpu.memory_space<vmem>>, %arg3: memref<128x128xbf16, #tpu.memory_space<vmem>>, %arg4: memref<4x128xf32, #tpu.memory_space<vmem>>, %arg5: memref<128x128xbf16, #tpu.memory_space<vmem>>, %arg6: memref<1x16xf32, #tpu.memory_space<vmem>>) attributes {dimension_semantics = [#tpu.dimension_semantics<parallel>], iteration_bounds = array<i64: 1>, scalar_prefetch = 0 : i64, scratch_operands = 0 : i64, tpu.core_type = #tpu.core_type<tc>, window_params = [{transform_indices = @transform_0, window_bounds = array<i64: 16, 128>}, {transform_indices = @transform_1, window_bounds = array<i64: 16, 128>}, {pipeline_mode = #tpu.pipeline_mode<synchronous>, transform_indices = @transform_2, window_bounds = array<i64: 128, 128>}, {pipeline_mode = #tpu.pipeline_mode<synchronous>, transform_indices = @transform_3, window_bounds = array<i64: 4, 128>}, {pipeline_mode = #tpu.pipeline_mode<synchronous>, transform_indices = @transform_4, window_bounds = array<i64: 128, 128>}, {transform_indices = @transform_5, window_bounds = array<i64: 1, 16>}]} {
    %c0 = arith.constant 0 : index
    %c0_0 = arith.constant 0 : index
    %0 = vector.load %arg1[%c0, %c0_0] : memref<16x128xf32, #tpu.memory_space<vmem>>, vector<16x128xf32>
    %c0_1 = arith.constant 0 : index
    %c0_2 = arith.constant 0 : index
    %1 = vector.load %arg2[%c0_1, %c0_2] : memref<16x128xf32, #tpu.memory_space<vmem>>, vector<16x128xf32>
    %c0_3 = arith.constant 0 : index
    %c0_4 = arith.constant 0 : index
    %2 = vector.load %arg4[%c0_3, %c0_4] : memref<4x128xf32, #tpu.memory_space<vmem>>, vector<1x128xf32>
    %c1 = arith.constant 1 : index
    %c0_5 = arith.constant 0 : index
    %3 = vector.load %arg4[%c1, %c0_5] : memref<4x128xf32, #tpu.memory_space<vmem>>, vector<1x128xf32>
    %c2 = arith.constant 2 : index
    %c0_6 = arith.constant 0 : index
    %4 = vector.load %arg4[%c2, %c0_6] : memref<4x128xf32, #tpu.memory_space<vmem>>, vector<1x128xf32>
    %c3 = arith.constant 3 : index
    %c0_7 = arith.constant 0 : index
    %5 = vector.load %arg4[%c3, %c0_7] : memref<4x128xf32, #tpu.memory_space<vmem>>, vector<1x128xf32>
    %6 = arith.truncf %0 : vector<16x128xf32> to vector<16x128xbf16>
    %c0_8 = arith.constant 0 : index
    %c0_9 = arith.constant 0 : index
    %7 = vector.load %arg3[%c0_8, %c0_9] : memref<128x128xbf16, #tpu.memory_space<vmem>>, vector<128x128xbf16>
    %cst = arith.constant dense<0.000000e+00> : vector<16x128xf32>
    %8 = tpu.matmul %6, %7, %cst {dimension_numbers = #tpu.dot_dimension_numbers<[1], [0], [0], [1], [0, 0, 1, 1], [], []>} : vector<16x128xbf16>, vector<128x128xbf16>, vector<16x128xf32> -> vector<16x128xf32>
    %9 = vector.broadcast %2 : vector<1x128xf32> to vector<16x128xf32>
    %10 = arith.addf %8, %9 : vector<16x128xf32>
    %cst_10 = arith.constant dense<0.000000e+00> : vector<16xf32>
    %11 = vector.multi_reduction <add>, %10, %cst_10 [1] : vector<16x128xf32> to vector<16xf32>
    %12 = vector.shape_cast %11 : vector<16xf32> to vector<16x1xf32>
    %cst_11 = arith.constant 7.812500e-03 : f32
    %13 = vector.broadcast %cst_11 : f32 to vector<16x1xf32>
    %14 = arith.mulf %12, %13 : vector<16x1xf32>
    %15 = arith.mulf %10, %10 : vector<16x128xf32>
    %cst_12 = arith.constant dense<0.000000e+00> : vector<16xf32>
    %16 = vector.multi_reduction <add>, %15, %cst_12 [1] : vector<16x128xf32> to vector<16xf32>
    %17 = vector.shape_cast %16 : vector<16xf32> to vector<16x1xf32>
    %cst_13 = arith.constant 7.812500e-03 : f32
    %18 = vector.broadcast %cst_13 : f32 to vector<16x1xf32>
    %19 = arith.mulf %17, %18 : vector<16x1xf32>
    %20 = arith.mulf %14, %14 : vector<16x1xf32>
    %21 = arith.subf %19, %20 : vector<16x1xf32>
    %22 = vector.broadcast %14 : vector<16x1xf32> to vector<16x128xf32>
    %23 = arith.subf %10, %22 : vector<16x128xf32>
    %cst_14 = arith.constant 9.99999974E-6 : f32
    %24 = vector.broadcast %cst_14 : f32 to vector<16x1xf32>
    %25 = arith.addf %21, %24 : vector<16x1xf32>
    %26 = math.rsqrt %25 : vector<16x1xf32>
    %27 = vector.broadcast %26 : vector<16x1xf32> to vector<16x128xf32>
    %28 = arith.mulf %23, %27 : vector<16x128xf32>
    %29 = vector.broadcast %3 : vector<1x128xf32> to vector<16x128xf32>
    %30 = arith.mulf %28, %29 : vector<16x128xf32>
    %31 = vector.broadcast %4 : vector<1x128xf32> to vector<16x128xf32>
    %32 = arith.addf %30, %31 : vector<16x128xf32>
    %cst_15 = arith.constant 5.000000e-01 : f32
    %33 = vector.broadcast %cst_15 : f32 to vector<16x128xf32>
    %34 = arith.mulf %33, %32 : vector<16x128xf32>
    %cst_16 = arith.constant 0.707106769 : f32
    %35 = vector.broadcast %cst_16 : f32 to vector<16x128xf32>
    %36 = arith.mulf %32, %35 : vector<16x128xf32>
    %37 = math.erf %36 : vector<16x128xf32>
    %cst_17 = arith.constant 1.000000e+00 : f32
    %38 = vector.broadcast %cst_17 : f32 to vector<16x128xf32>
    %39 = arith.addf %38, %37 : vector<16x128xf32>
    %40 = arith.mulf %34, %39 : vector<16x128xf32>
    %41 = arith.truncf %40 : vector<16x128xf32> to vector<16x128xbf16>
    %c0_18 = arith.constant 0 : index
    %c0_19 = arith.constant 0 : index
    %42 = vector.load %arg5[%c0_18, %c0_19] : memref<128x128xbf16, #tpu.memory_space<vmem>>, vector<128x128xbf16>
    %cst_20 = arith.constant dense<0.000000e+00> : vector<16x128xf32>
    %43 = tpu.matmul %41, %42, %cst_20 {dimension_numbers = #tpu.dot_dimension_numbers<[1], [0], [0], [1], [0, 0, 1, 1], [], []>} : vector<16x128xbf16>, vector<128x128xbf16>, vector<16x128xf32> -> vector<16x128xf32>
    %44 = vector.broadcast %5 : vector<1x128xf32> to vector<16x128xf32>
    %45 = arith.addf %43, %44 : vector<16x128xf32>
    %46 = arith.mulf %45, %1 : vector<16x128xf32>
    %cst_21 = arith.constant 1.000000e+00 : f32
    %47 = vector.broadcast %cst_21 : f32 to vector<1x128xf32>
    %cst_22 = arith.constant dense<0.000000e+00> : vector<1x16xf32>
    %48 = tpu.matmul %47, %46, %cst_22 {dimension_numbers = #tpu.dot_dimension_numbers<[1], [1], [0], [0], [0, 0, 1, 0], [], []>} : vector<1x128xf32>, vector<16x128xf32>, vector<1x16xf32> -> vector<1x16xf32>
    %c0_23 = arith.constant 0 : index
    %c0_24 = arith.constant 0 : index
    %49 = vector.load %arg6[%c0_23, %c0_24] : memref<1x16xf32, #tpu.memory_space<vmem>>, vector<1x16xf32>
    tpu.vector_store %arg6[%c0_23, %c0_24], %48 {strides = array<i32>} : memref<1x16xf32, #tpu.memory_space<vmem>>, vector<1x16xf32>,
    return
  }
  func.func @transform_0(%arg0: i32) -> (i32, i32) {
    %c0_i32 = arith.constant 0 : i32
    %c0_i32_0 = arith.constant 0 : i32
    return %arg0, %c0_i32 : i32, i32
  }
  func.func @transform_1(%arg0: i32) -> (i32, i32) {
    %c0_i32 = arith.constant 0 : i32
    %c0_i32_0 = arith.constant 0 : i32
    return %arg0, %c0_i32 : i32, i32
  }
  func.func @transform_2(%arg0: i32) -> (i32, i32) {
    %c0_i32 = arith.constant 0 : i32
    %c0_i32_0 = arith.constant 0 : i32
    %c0_i32_1 = arith.constant 0 : i32
    return %c0_i32, %c0_i32_0 : i32, i32
  }
  func.func @transform_3(%arg0: i32) -> (i32, i32) {
    %c0_i32 = arith.constant 0 : i32
    %c0_i32_0 = arith.constant 0 : i32
    %c0_i32_1 = arith.constant 0 : i32
    return %c0_i32, %c0_i32_0 : i32, i32
  }
  func.func @transform_4(%arg0: i32) -> (i32, i32) {
    %c0_i32 = arith.constant 0 : i32
    %c0_i32_0 = arith.constant 0 : i32
    %c0_i32_1 = arith.constant 0 : i32
    return %c0_i32, %c0_i32_0 : i32, i32
  }
  func.func @transform_5(%arg0: i32) -> (i32, i32) {
    %c0_i32 = arith.constant 0 : i32
    %c0_i32_0 = arith.constant 0 : i32
    return %c0_i32, %arg0 : i32, i32
  }
}

</mosaic_0001>

<bundles_post_ra>
// kernel: predictor_forward.1
= control target key start
LH: loop header
LB: loop body
LE: loop exit
PB: predicated region body
PF: predicated region fallthrough
CT: control target
= control target key end

     0   :  { %10 = vsyncpa [#allocation3], 0  ;;  %s786_s0 = inlined_call_operand.hbm [shape: f32[16,128], index: 0, kind: input, shape index: {}]   ;;  %s787_s1 = inlined_call_operand.hbm [shape: f32[16,128], index: 1, kind: input, shape index: {}]   ;;  %s788_s2 = inlined_call_operand.hbm [shape: bf16[128,128], index: 2, kind: input, shape index: {}]   ;;  %s789_s3 = inlined_call_operand.hbm [shape: f32[4,128], index: 3, kind: input, shape index: {}]   ;;  %s790_s4 = inlined_call_operand.hbm [shape: bf16[128,128], index: 4, kind: input, shape index: {}]   ;;  %s791_s5 = inlined_call_operand.hbm [shape: f32[1,16], index: 5, kind: output, shape index: {}]  }
   0x1   :  { %11 = vsyncpa [#allocation6], 0 }
   0x2   :  { %12 = vsyncpa [#allocation9], 0 }
   0x3   :  { %13 = vsyncpa [#allocation4], 0  ;;  %s31_s20 = sshll.u32 %s787_s1, 4  ;;  %s703_s21 = smov [#allocation5]   ;;  %s32_s20 = int_to_ptr.hbm [resolvable:$true] %s31_s20 }
   0x4   :  { %s33_s22 = sshll.u32 %s703_s21, 4  ;;  %s58_s25 = sshll.u32 %s789_s3, 4  ;;  %s34_s22 = int_to_ptr.vmem [resolvable:$true] %s33_s22  ;;  %s59_s25 = int_to_ptr.hbm [resolvable:$true] %s58_s25 }
   0x5   :  { %s704_s26 = smov 128   ;;  %s705_s27 = smov 8  }
   0x6   :  { %39 = dma.hbm_to_vmem [thread:$0]  %s32_s20, 256, %s34_s22, [#allocation6], %s704_s26, %s704_s26, %s705_s27  }
   0x7   :  { %s706_s28 = smov [#allocation8]   ;;  %s18_s7 = sshll.u32 %s786_s0, 4  ;;  %s19_s7 = int_to_ptr.hbm [resolvable:$true] %s18_s7 }
   0x8   :  { %s60_s29 = sshll.u32 %s706_s28, 4  ;;  %s44_s9 = sshll.u32 %s788_s2, 4  ;;  %s61_s29 = int_to_ptr.vmem [resolvable:$true] %s60_s29  ;;  %s45_s9 = int_to_ptr.hbm [resolvable:$true] %s44_s9 }
   0x9   :  { %63 = dma.hbm_to_vmem [thread:$0]  %s59_s25, 64, %s61_s29, [#allocation9]  }
   0xa   :  { %s707_s10 = smov [#allocation2]   ;;  %s708_s3 = smov [#allocation7]  }
   0xb   :  { %s20_s11 = sshll.u32 %s707_s10, 4  ;;  %s46_s12 = sshll.u32 %s708_s3, 4  ;;  %s21_s11 = int_to_ptr.vmem [resolvable:$true] %s20_s11  ;;  %s47_s12 = int_to_ptr.vmem [resolvable:$true] %s46_s12 }
   0xc   :  { %26 = dma.hbm_to_vmem [thread:$0]  %s19_s7, 256, %s21_s11, [#allocation3], %s704_s26, %s704_s26, %s705_s27  }
   0xd   :  { %s709_s13 = smov 64   ;;  %s710_s14 = smov 4  }
   0xe   :  { %52 = dma.hbm_to_vmem [thread:$0]  %s45_s9, 1024, %s47_s12, [#allocation6], %s709_s13, %s709_s13, %s710_s14  }
   0xf   :  { %s68_s16 = sshll.u32 %s790_s4, 4  ;;  %s711_s17 = smov [#allocation10]   ;;  %s69_s16 = int_to_ptr.hbm [resolvable:$true] %s68_s16 }
  0x10   :  { %s70_s18 = sshll.u32 %s711_s17, 4  ;;  %s71_s18 = int_to_ptr.vmem [resolvable:$true] %s70_s18 }
  0x11   :  { %76 = dma.hbm_to_vmem [thread:$0]  %s69_s16, 1024, %s71_s18, [#allocation9], %s709_s13, %s709_s13, %s710_s14  }
  0x12   :  { %695 = dma.done.wait [#allocation3], 256  }
  0x13   :  { %696 = vsyncadd [#allocation3], 4294967040 }
  0x14   :  { %697 = dma.done.wait [#allocation6], 1280  }
  0x15   :  { %698 = vsyncadd [#allocation6], 4294966016 }
  0x16   :  { %699 = dma.done.wait [#allocation9], 1088  }
  0x17   :  { %700 = vsyncadd [#allocation9], 4294966208  ;;  %v519_v0 = vld [vmem:[#allocation7 + $0x38] sm:$0xff]  ;;  %v518_v1 = vld [vmem:[#allocation7 + $0x30] sm:$0xff]  ;;  %s713_s2 = smov [#allocation11]   ;;  %s434_s21 = sshll.u32 %s791_s5, 4  ;;  %s435_s21 = int_to_ptr.hbm [resolvable:$true] %s434_s21 }
  0x18   :  { %171 = vmatpush.bf16.msra.mxu0 %v519_v0  ;;  %v517_v2 = vld [vmem:[#allocation7 + $0x28] sm:$0xff]  ;;  %v516_v3 = vld [vmem:[#allocation7 + $0x20] sm:$0xff]  ;;  %v515_v4 = vld [vmem:[#allocation7 + $0x18] sm:$0xff]  ;;  %s432_s4 = sshll.u32 %s713_s2, 4  ;;  %vm425_vm14 = vcmask 122880   ;;  %s433_s4 = int_to_ptr.vmem [resolvable:$true] %s432_s4 }
  0x19   :  { %v514_v5 = vld [vmem:[#allocation7 + $0x10] sm:$0xff]  ;;  %v513_v6 = vld [vmem:[#allocation7 + $0x8] sm:$0xff]  ;;  %v512_v7 = vld [vmem:[#allocation7] sm:$0xff] }
  0x1a   :  { %v97_v8 = vld [vmem:[#allocation2] sm:$0xff]  ;;  %v98_v9 = vld [vmem:[#allocation2 + $0x8] sm:$0xff]  ;;  %v526_v25 = vld [vmem:[#allocation10 + $0x30] sm:$0xff] }
  0x1b   :  { %v105_v10 = vpack.c.bf16 %v98_v9, %v97_v8  ;;  %v539_v11 = vld [vmem:[#allocation8] ss:$0 sm:$0xff]  ;;  %v525_v29 = vld [vmem:[#allocation10 + $0x28] sm:$0xff]  ;;  %v524_v34 = vld [vmem:[#allocation10 + $0x20] sm:$0xff] }
  0x1c   :  { %172 = vmatpush.bf16.msra.mxu0 %v518_v1  ;;  %v527_v23 = vld [vmem:[#allocation10 + $0x38] sm:$0xff]  ;;  %v522_v41 = vld [vmem:[#allocation10 + $0x10] sm:$0xff]  ;;  %v521_v47 = vld [vmem:[#allocation10 + $0x8] sm:$0xff] }
  0x1d   :  { %389 = vmatpush.bf16.msra.mxu1 %v527_v23  ;;  %v523_v38 = vld [vmem:[#allocation10 + $0x18] sm:$0xff]  ;;  %v520_v54 = vld [vmem:[#allocation10] sm:$0xff] }
  0x1e   :  { %v540_v48 = vld [vmem:[#allocation8 + $0x1] ss:$0 sm:$0xff]  ;;  %v541_v52 = vld [vmem:[#allocation8 + $0x2] ss:$0 sm:$0xff] }
  0x20   :  { %173 = vmatpush.bf16.msra.mxu0 %v517_v2 }
  0x21   :  { %390 = vmatpush.bf16.msra.mxu1 %v526_v25 }
  0x24   :  { %174 = vmatpush.bf16.msra.mxu0 %v516_v3 }
  0x25   :  { %391 = vmatpush.bf16.msra.mxu1 %v525_v29 }
  0x28   :  { %175 = vmatpush.bf16.msra.mxu0 %v515_v4 }
  0x29   :  { %392 = vmatpush.bf16.msra.mxu1 %v524_v34 }
  0x2c   :  { %176 = vmatpush.bf16.msra.mxu0 %v514_v5 }
  0x2d   :  { %393 = vmatpush.bf16.msra.mxu1 %v523_v38 }
  0x30   :  { %177 = vmatpush.bf16.msra.mxu0 %v513_v6 }
  0x31   :  { %394 = vmatpush.bf16.msra.mxu1 %v522_v41 }
  0x34   :  { %178 = vmatpush.bf16.msra.mxu0 %v512_v7 }
  0x35   :  { %395 = vmatpush.bf16.msra.mxu1 %v521_v47 }
  0x37   :  { %179 = vmatmul.bf16.vlgmr.msra.gmra.mxu0 %v105_v10 }
  0x39   :  { %396 = vmatpush.bf16.msra.mxu1 %v520_v54 }
  0xb4   :  { %v180_v12 = vpop.f32.mrf.mxu0 }
  0xb5   :  { %v181_v13 = vadd.f32 %v539_v11, %v180_v12 }
  0xb7   :  { %185 = vadd.xlane.f32.xlu0 %v181_v13  ;;  %v191_v14 = vmul.f32 %v181_v13, %v181_v13 }
  0xb9   :  { %193 = vadd.xlane.f32.xlu1 %v191_v14 }
  0xbc   :  { %v182_v15 = vpop.f32.mrf.mxu0 }
  0xbd   :  { %v759_v16 = vadd.f32 %v539_v11, %v182_v15 }
  0xbf   :  { %187 = vadd.xlane.f32.xlu0 %v759_v16  ;;  %v192_v17 = vmul.f32 %v759_v16, %v759_v16 }
  0xc1   :  { %195 = vadd.xlane.f32.xlu1 %v192_v17 }
 0x12a   :  { %v186_v18 = vpop.xlane.xlu0 %185 }
 0x12b   :  { %v189_v19 = vmul.f32 0.0078125, %v186_v18 }
 0x12c   :  { %v194_v20 = vpop.xlane.xlu1 %193 }
 0x12d   :  { %v199_v21 = vmul.f32 %v189_v19, %v189_v19  ;;  %v197_v22 = vmul.f32 0.0078125, %v194_v20  ;;  %v203_v46 = vsub.f32 %v181_v13, %v189_v19 }
 0x12f   :  { %v201_v24 = vsub.f32 %v197_v22, %v199_v21 }
 0x131   :  { %v205_v26 = vadd.f32 1e-05, %v201_v24 }
 0x132   :  { %v188_v27 = vpop.xlane.xlu0 %187 }
 0x133   :  { %543 = vrsqrt.f32 %v205_v26  ;;  %v190_v28 = vmul.f32 0.0078125, %v188_v27  ;;  %vm213_vm1 = vweird.f32 %v205_v26 }
 0x134   :  { %v196_v30 = vpop.xlane.xlu1 %195 }
 0x135   :  { %v200_v31 = vmul.f32 %v190_v28, %v190_v28  ;;  %v198_v32 = vmul.f32 0.0078125, %v196_v30  ;;  %v204_v59 = vsub.f32 %v759_v16, %v190_v28 }
 0x137   :  { %v202_v33 = vsub.f32 %v198_v32, %v200_v31 }
 0x139   :  { %v544_v35 = vpop.eup %543  ;;  %v206_v36 = vadd.f32 1e-05, %v202_v33 }
 0x13a   :  { %v208_v37 = vmul.f32 %v544_v35, %v205_v26  ;;  %vm214_vm0 = vweird.f32 %v544_v35 }
 0x13b   :  { %545 = vrsqrt.f32 %v206_v36  ;;  %vm215_vm2 = vmor %vm213_vm1, %vm214_vm0  ;;  %vm223_vm4 = vweird.f32 %v206_v36 }
 0x13c   :  { %v209_v39 = vmul.f32 %v544_v35, %v208_v37 }
 0x13e   :  { %v210_v40 = vmul.f32 0.5, %v209_v39 }
 0x140   :  { %v211_v42 = vsub.f32 1.5, %v210_v40 }
 0x141   :  { %v546_v43 = vpop.eup %545 }
 0x142   :  { %v212_v44 = vmul.f32 %v544_v35, %v211_v42  ;;  %v218_v45 = vmul.f32 %v546_v43, %v206_v36  ;;  %vm224_vm3 = vweird.f32 %v546_v43 }
 0x143   :  { %vm225_vm5 = vmor %vm223_vm4, %vm224_vm3 }
 0x144   :  { %v216_v49 = vsel %vm215_vm2, %v544_v35, %v212_v44  ;;  %v219_v50 = vmul.f32 %v546_v43, %v218_v45 }
 0x145   :  { %v227_v51 = vmul.f32 %v216_v49, %v203_v46 }
 0x146   :  { %v220_v53 = vmul.f32 0.5, %v219_v50 }
 0x147   :  { %v230_v55 = vmul.f32 %v540_v48, %v227_v51 }
 0x148   :  { %v221_v56 = vsub.f32 1.5, %v220_v53 }
 0x149   :  { %v764_v57 = vadd.f32 %v541_v52, %v230_v55 }
 0x14a   :  { %v222_v58 = vmul.f32 %v546_v43, %v221_v56 }
 0x14b   :  { %v768_v60 = vmul.f32 0.70710677, %v764_v57 }
 0x14c   :  { %v226_v61 = vsel %vm225_vm5, %v546_v43, %v222_v58 }
 0x14d   :  { %v228_v62 = vmul.f32 %v226_v61, %v204_v59  ;;  %v239_v63 = vmul.f32 %v768_v60, %v768_v60 }
 0x14f   :  { %v231_v0 = vmul.f32 %v540_v48, %v228_v62  ;;  %v240_v1 = vmin.f32 %v239_v63, 16.0 }
 0x151   :  { %v772_v2 = vadd.f32 %v541_v52, %v231_v0  ;;  %v241_v3 = vmul.f32 2.1237322e-06, %v240_v1  ;;  %v252_v4 = vmul.f32 3.8918573e-05, %v240_v1 }
 0x153   :  { %v775_v5 = vmul.f32 0.70710677, %v772_v2  ;;  %v242_v6 = vadd.f32 0.00028619796, %v241_v3  ;;  %v253_v7 = vadd.f32 0.001143296, %v252_v4 }
 0x155   :  { %v279_v8 = vmul.f32 %v775_v5, %v775_v5  ;;  %v243_v9 = vmul.f32 %v242_v6, %v240_v1  ;;  %v254_v10 = vmul.f32 %v253_v7, %v240_v1 }
 0x157   :  { %v280_v11 = vmin.f32 %v279_v8, 16.0  ;;  %v255_v12 = vadd.f32 0.014752088, %v254_v10  ;;  %v244_v15 = vadd.f32 0.0036580483, %v243_v9 }
 0x159   :  { %v281_v13 = vmul.f32 2.1237322e-06, %v280_v11  ;;  %v292_v14 = vmul.f32 3.8918573e-05, %v280_v11  ;;  %v256_v16 = vmul.f32 %v255_v12, %v240_v1  ;;  %v245_v22 = vmul.f32 %v244_v15, %v240_v1 }
 0x15a   :  { %v235_v12 = vmul.f32 0.5, %v764_v57 }
 0x15b   :  { %v282_v17 = vadd.f32 0.00028619796, %v281_v13  ;;  %v293_v18 = vadd.f32 0.001143296, %v292_v14  ;;  %v257_v19 = vadd.f32 0.112945676, %v256_v16 }
 0x15c   :  { %v246_v28 = vadd.f32 0.05243302, %v245_v22  ;;  %v236_v13 = vmul.f32 0.5, %v772_v2 }
 0x15d   :  { %v283_v20 = vmul.f32 %v282_v17, %v280_v11  ;;  %v294_v21 = vmul.f32 %v293_v18, %v280_v11  ;;  %v258_v23 = vmul.f32 %v257_v19, %v240_v1  ;;  %v542_v19 = vld [vmem:[#allocation8 + $0x3] ss:$0 sm:$0xff] }
 0x15e   :  { %v247_v34 = vmul.f32 %v246_v28, %v240_v1 }
 0x15f   :  { %v284_v24 = vadd.f32 0.0036580483, %v283_v20  ;;  %v295_v25 = vadd.f32 0.014752088, %v294_v21  ;;  %v259_v26 = vadd.f32 0.4994258, %v258_v23 }
 0x160   :  { %v248_v38 = vadd.f32 0.18741608, %v247_v34  ;;  %v100_v21 = vld [vmem:[#allocation5 + $0x8] sm:$0xff] }
 0x161   :  { %v296_v27 = vmul.f32 %v295_v25, %v280_v11  ;;  %v260_v29 = vmul.f32 %v259_v26, %v240_v1  ;;  %v285_v30 = vmul.f32 %v284_v24, %v280_v11  ;;  %v99_v24 = vld [vmem:[#allocation5] sm:$0xff]  ;;  %v712_v26 = vmov 1.0  }
 0x162   :  { %v249_v43 = vmul.f32 %v248_v38, %v240_v1 }
 0x163   :  { %v297_v31 = vadd.f32 0.112945676, %v296_v27  ;;  %v261_v32 = vadd.f32 1.0, %v260_v29  ;;  %v286_v35 = vadd.f32 0.05243302, %v285_v30 }
 0x164   :  { %v250_v49 = vadd.f32 1.1283791, %v249_v43 }
 0x165   :  { %v298_v33 = vmul.f32 %v297_v31, %v280_v11  ;;  %547 = vrcp.f32 %v261_v32  ;;  %v287_v39 = vmul.f32 %v286_v35, %v280_v11  ;;  %v273_v46 = vand.u32 2147483648, %v261_v32 }
 0x166   :  { %v271_v48 = vand.u32 2147483647, %v261_v32  ;;  %vm267_vm7 = vweird.f32 %v261_v32  ;;  %v251_v56 = vmul.f32 %v250_v49, %v768_v60 }
 0x167   :  { %v299_v36 = vadd.f32 0.4994258, %v298_v33  ;;  %v288_v45 = vadd.f32 0.18741608, %v287_v39  ;;  %v274_v53 = vor.u32 1.1754944e-38, %v273_v46 }
 0x168   :  { %vm272_vm9 = vcmp.eq.f32.partialorder %v271_v48, 8.507059e+37 }
 0x169   :  { %v300_v37 = vmul.f32 %v299_v36, %v280_v11  ;;  %v289_v52 = vmul.f32 %v288_v45, %v280_v11 }
 0x16b   :  { %v301_v40 = vadd.f32 1.0, %v300_v37  ;;  %v548_v41 = vpop.eup %547  ;;  %v290_v61 = vadd.f32 1.1283791, %v289_v52 }
 0x16c   :  { %v263_v42 = vmul.f32 %v548_v41, %v261_v32  ;;  %vm268_vm6 = vweird.f32 %v548_v41 }
 0x16d   :  { %549 = vrcp.f32 %v301_v40  ;;  %vm269_vm8 = vmor %vm267_vm7, %vm268_vm6  ;;  %v313_v62 = vand.u32 2147483648, %v301_v40  ;;  %v311_v1 = vand.u32 2147483647, %v301_v40  ;;  %vm307_vm11 = vweird.f32 %v301_v40 }
 0x16e   :  { %v264_v44 = vsub.f32 1.0, %v263_v42  ;;  %v291_v7 = vmul.f32 %v290_v61, %v775_v5 }
 0x16f   :  { %v314_v4 = vor.u32 1.1754944e-38, %v313_v62  ;;  %vm312_vm13 = vcmp.eq.f32.partialorder %v311_v1, 8.507059e+37 }
 0x170   :  { %v265_v47 = vmul.f32 %v548_v41, %v264_v44 }
 0x172   :  { %v266_v51 = vadd.f32 %v548_v41, %v265_v47 }
 0x173   :  { %v550_v50 = vpop.eup %549 }
 0x174   :  { %v303_v54 = vmul.f32 %v550_v50, %v301_v40  ;;  %v270_v55 = vsel %vm269_vm8, %v548_v41, %v266_v51  ;;  %vm308_vm10 = vweird.f32 %v550_v50 }
 0x175   :  { %v275_v58 = vsel %vm272_vm9, %v274_v53, %v270_v55  ;;  %vm309_vm12 = vmor %vm307_vm11, %vm308_vm10 }
 0x176   :  { %v304_v59 = vsub.f32 1.0, %v303_v54  ;;  %v276_v63 = vmul.f32 %v275_v58, %v251_v56 }
 0x178   :  { %v305_v0 = vmul.f32 %v550_v50, %v304_v59  ;;  %v478_v6 = vclamps-f32 %v276_v63, 1.0 }
 0x17a   :  { %v306_v3 = vadd.f32 %v550_v50, %v305_v0  ;;  %v319_v11 = vadd.f32 1.0, %v478_v6 }
 0x17c   :  { %v310_v8 = vsel %vm309_vm12, %v550_v50, %v306_v3  ;;  %v321_v15 = vmul.f32 %v319_v11, %v235_v12 }
 0x17d   :  { %v315_v9 = vsel %vm312_vm13, %v314_v4, %v310_v8 }
 0x17e   :  { %v316_v10 = vmul.f32 %v315_v9, %v291_v7 }
 0x180   :  { %v479_v60 = vclamps-f32 %v316_v10, 1.0 }
 0x182   :  { %v320_v14 = vadd.f32 1.0, %v479_v60 }
 0x184   :  { %v322_v16 = vmul.f32 %v320_v14, %v236_v13 }
 0x186   :  { %v323_v17 = vpack.c.bf16 %v322_v16, %v321_v15 }
 0x188   :  { %397 = vmatmul.bf16.vlgmr.msra.gmra.mxu1 %v323_v17 }
 0x205   :  { %v398_v18 = vpop.f32.mrf.mxu1 }
 0x206   :  { %v399_v22 = vadd.f32 %v542_v19, %v398_v18 }
 0x208   :  { %v403_v25 = vmul.f32 %v399_v22, %v99_v24 }
 0x20d   :  { %v400_v20 = vpop.f32.mrf.mxu1 }
 0x20e   :  { %v401_v5 = vadd.f32 %v542_v19, %v400_v20 }
 0x210   :  { %v404_v23 = vmul.f32 %v401_v5, %v100_v21 }
 0x212   :  { %419 = vmatpush.xpose.msra.mxu2 %v404_v23 }
 0x216   :  { %420 = vmatpush.xpose.msra.mxu2 %v403_v25 }
 0x219   :  { %421 = vmatmul.f32.vlgmr.msra.gmra.mxu2 %v712_v26 }
 0x29c   :  { %v422_v57 = vpop.f32.mrf.mxu2 }
 0x29d   :  { %426 = vst.msk [vmem:[#allocation11] sm:$0x1] %vm425_vm14, %v422_v57 }
 0x29e   :  { %437 = dma.vmem_to_hbm [thread:$0]  %s433_s4, 16, %s435_s21, [#allocation4]  }
 0x29f   :  { %701 = dma.done.wait [#allocation4], 16  }
 0x2a0   :  { %702 = vsyncadd [#allocation4], 4294967280 }
 0x2a1   :  { %442 = vsyncpa [#allocation3], 1 }
 0x2a2   :  { %443 = vsyncpa [#allocation6], 1 }
 0x2a3   :  { %444 = vsyncpa [#allocation9], 1 }
 0x2a4   :  { %445 = vsyncpa [#allocation4], 1 }

</bundles_post_ra>
